<compile_context>
chip_gen: v7x
topology: tpu7x:2x2x1
jax: 0.10.0
libtpu: 0.0.40
codegen_flags: <defaults>
</compile_context>

<pallas_src>
import functools

import jax
import jax.numpy as jnp
from jax import lax
from jax.experimental import pallas as pl
from jax.experimental.pallas import tpu as pltpu  # noqa: F401  (TPU backend assumed)


# ----------------------------------------------------------------------------
# Fused kernel: embedding gather -> hoisted input projection -> unrolled GRU ->
#               VAE heads -> KL.  Everything is tiny, so all operands live in
#               VMEM as full blocks (no grid).
# ----------------------------------------------------------------------------
def vae_encoder_kernel(tok_ref, emb_ref, wih_ref, bih_ref, whh_ref, bhh_ref,
                       wmu_ref, bmu_ref, wlv_ref, blv_ref, eps_ref,
                       z_ref, kl_ref, *, T, B, H):
    V = emb_ref.shape[0]

    # ---- embedding lookup as a one-hot matmul (rows are time-major: row = t*B + b)
    tok = tok_ref[...]                                          # (T*B, 1) int32
    vocab_iota = lax.broadcasted_iota(jnp.int32, (T * B, V), 1)
    onehot = (tok == vocab_iota).astype(jnp.float32)            # (T*B, V)
    x_emb = jnp.dot(onehot, emb_ref[...],
                    preferred_element_type=jnp.float32)         # (T*B, E)

    # ---- hoisted input projection for ALL timesteps (one lane-dense matmul)
    x_proj = jnp.dot(x_emb, wih_ref[...],
                     preferred_element_type=jnp.float32) + bih_ref[...]   # (T*B, 3H)

    w_hh = whh_ref[...]                                         # (H, 3H)
    b_hh = bhh_ref[...]                                         # (1, 3H)

    # ---- unrolled GRU recurrence (trace-time loop; T is small and static)
    h = jnp.zeros((B, H), jnp.float32)
    for t in range(T):
        xp = x_proj[t * B:(t + 1) * B, :]                       # (B, 3H), static slice
        hp = jnp.dot(h, w_hh, preferred_element_type=jnp.float32) + b_hh  # (B, 3H)

        i_r, i_z, i_n = xp[:, 0:H], xp[:, H:2 * H], xp[:, 2 * H:3 * H]
        h_r, h_z, h_n = hp[:, 0:H], hp[:, H:2 * H], hp[:, 2 * H:3 * H]

        r = jax.nn.sigmoid(i_r + h_r)
        zg = jax.nn.sigmoid(i_z + h_z)
        n = jnp.tanh(i_n + r * h_n)      # b_hh_n stays inside r*(...)  (PyTorch GRU)
        h = (1.0 - zg) * n + zg * h

    # ---- VAE heads + KL, fused in the same kernel (no 2nd launch / HBM roundtrip of h)
    mu = jnp.dot(h, wmu_ref[...], preferred_element_type=jnp.float32) + bmu_ref[...]
    logvar = jnp.dot(h, wlv_ref[...], preferred_element_type=jnp.float32) + blv_ref[...]
    z_ref[...] = mu + jnp.exp(0.5 * logvar) * eps_ref[...]

    per = jnp.exp(logvar) + mu * mu - 1.0 - logvar              # (B, Z)
    per_b = jnp.sum(per, axis=1, keepdims=True)                 # (B, 1)
    kl_ref[...] = 0.5 * jnp.mean(per_b, axis=0, keepdims=True)  # (1, 1)


def vae_encoder_forward(tokens, params, eps):
    """tokens: (B, T) int32; returns (z (B, Z), kl scalar)."""
    B, T = tokens.shape
    H = params["w_hh"].shape[0]
    Z = params["w_mu"].shape[-1]

    # Flat time-major token ids (row index = t*B + b); tiny int reshape in glue.
    tok_tm = jnp.transpose(tokens, (1, 0)).reshape(T * B, 1).astype(jnp.int32)

    kernel = functools.partial(vae_encoder_kernel, T=T, B=B, H=H)
    z, kl = pl.pallas_call(
        kernel,
        out_shape=(
            jax.ShapeDtypeStruct((B, Z), jnp.float32),
            jax.ShapeDtypeStruct((1, 1), jnp.float32),
        ),
    )(tok_tm, params["emb"],
      params["w_ih"], params["b_ih"], params["w_hh"], params["b_hh"],
      params["w_mu"], params["b_mu"], params["w_lv"], params["b_lv"], eps)
    return z, kl[0, 0]


# ----------------------------------------------------------------------------
# Parameters (gate-concatenated, pre-transposed to (in, out); gate order r, z, n)
# ----------------------------------------------------------------------------
def make_params(key, n_vocab, d_emb, d_h, d_z):
    ks = jax.random.split(key, 9)
    k_h = 1.0 / jnp.sqrt(d_h)

    emb = jax.random.normal(ks[0], (n_vocab, d_emb), jnp.float32)

    w_ih = jax.random.uniform(ks[1], (d_emb, 3 * d_h), jnp.float32, -k_h, k_h)
    w_hh = jax.random.uniform(ks[2], (d_h, 3 * d_h), jnp.float32, -k_h, k_h)
    b_ih = jax.random.uniform(ks[3], (1, 3 * d_h), jnp.float32, -k_h, k_h)
    b_hh = jax.random.uniform(ks[4], (1, 3 * d_h), jnp.float32, -k_h, k_h)

    w_mu = jax.random.uniform(ks[5], (d_h, d_z), jnp.float32, -k_h, k_h)
    b_mu = jax.random.uniform(ks[6], (1, d_z), jnp.float32, -k_h, k_h)
    w_lv = jax.random.uniform(ks[7], (d_h, d_z), jnp.float32, -k_h, k_h)
    b_lv = jax.random.uniform(ks[8], (1, d_z), jnp.float32, -k_h, k_h)

    return dict(emb=emb, w_ih=w_ih, w_hh=w_hh, b_ih=b_ih, b_hh=b_hh,
                w_mu=w_mu, b_mu=b_mu, w_lv=w_lv, b_lv=b_lv)


# ----------------------------------------------------------------------------
# Pure-JAX reference (same math, direct gather + per-step projection)
# ----------------------------------------------------------------------------
def ref_forward(tokens, params, eps):
    B, T = tokens.shape
    H = params["w_hh"].shape[0]
    emb = params["emb"][tokens]                       # (B, T, E)
    h = jnp.zeros((B, H), jnp.float32)
    for t in range(T):
        x_t = emb[:, t, :]
        gi = x_t @ params["w_ih"] + params["b_ih"]
        gh = h @ params["w_hh"] + params["b_hh"]
        i_r, i_z, i_n = gi[:, :H], gi[:, H:2 * H], gi[:, 2 * H:]
        h_r, h_z, h_n = gh[:, :H], gh[:, H:2 * H], gh[:, 2 * H:]
        r = jax.nn.sigmoid(i_r + h_r)
        zg = jax.nn.sigmoid(i_z + h_z)
        n = jnp.tanh(i_n + r * h_n)
        h = (1.0 - zg) * n + zg * h
    mu = h @ params["w_mu"] + params["b_mu"]
    logvar = h @ params["w_lv"] + params["b_lv"]
    z = mu + jnp.exp(0.5 * logvar) * eps
    kl = 0.5 * jnp.mean(jnp.sum(jnp.exp(logvar) + mu * mu - 1.0 - logvar, axis=1))
    return z, kl


if __name__ == "__main__":
    # synthetic config: n_vocab=32, d_emb=32, q_d_h=32, q_n_layers=1, q_bidir=False,
    # d_z=16; batch=2, seq_len=8 (equal-length sequences -> pack_sequence is identity).
    B, T = 2, 8
    N_VOCAB, D_EMB, D_H, D_Z = 32, 32, 32, 16

    key = jax.random.PRNGKey(0)
    k_par, k_tok, k_eps = jax.random.split(key, 3)

    params = make_params(k_par, N_VOCAB, D_EMB, D_H, D_Z)
    tokens = jax.random.randint(k_tok, (B, T), 0, N_VOCAB, dtype=jnp.int32)
    eps = jax.random.normal(k_eps, (B, D_Z), jnp.float32)   # torch.randn_like(mu)

    z, kl = jax.block_until_ready(vae_encoder_forward(tokens, params, eps))
    assert z.shape == (B, D_Z) and kl.shape == ()

    # loose tolerance: MXU f32 matmul precision differs slightly from the XLA reference
    z_ref, kl_ref = ref_forward(tokens, params, eps)
    assert jnp.allclose(z, z_ref, rtol=5e-2, atol=5e-2)
    assert jnp.allclose(kl, kl_ref, rtol=5e-2, atol=5e-2)

    print("KERNEL_OK")
</pallas_src>

<mosaic_0001>
module attributes {stable_mosaic.version = 11 : i64} {
  func.func @vae_encoder_kernel(%arg0: memref<16x1xi32, #tpu.memory_space<vmem>>, %arg1: memref<32x32xf32, #tpu.memory_space<vmem>>, %arg2: memref<32x96xf32, #tpu.memory_space<vmem>>, %arg3: memref<1x96xf32, #tpu.memory_space<vmem>>, %arg4: memref<32x96xf32, #tpu.memory_space<vmem>>, %arg5: memref<1x96xf32, #tpu.memory_space<vmem>>, %arg6: memref<32x16xf32, #tpu.memory_space<vmem>>, %arg7: memref<1x16xf32, #tpu.memory_space<vmem>>, %arg8: memref<32x16xf32, #tpu.memory_space<vmem>>, %arg9: memref<1x16xf32, #tpu.memory_space<vmem>>, %arg10: memref<2x16xf32, #tpu.memory_space<vmem>>, %arg11: memref<2x16xf32, #tpu.memory_space<vmem>>, %arg12: memref<1x1xf32, #tpu.memory_space<vmem>>) attributes {dimension_semantics = [], scalar_prefetch = 0 : i64, scratch_operands = 0 : i64, tpu.core_type = #tpu.core_type<tc>} {
    %c0 = arith.constant 0 : index
    %c0_0 = arith.constant 0 : index
    %0 = vector.load %arg0[%c0, %c0_0] : memref<16x1xi32, #tpu.memory_space<vmem>>, vector<16x1xi32>
    %1 = tpu.iota {dimensions = array<i32: 1>} : vector<16x32xi32>
    %2 = vector.broadcast %0 : vector<16x1xi32> to vector<16x32xi32>
    %3 = arith.cmpi eq, %2, %1 : vector<16x32xi32>
    %4 = arith.extui %3 : vector<16x32xi1> to vector<16x32xi32>
    %5 = arith.sitofp %4 : vector<16x32xi32> to vector<16x32xf32>
    %c0_1 = arith.constant 0 : index
    %c0_2 = arith.constant 0 : index
    %6 = vector.load %arg1[%c0_1, %c0_2] : memref<32x32xf32, #tpu.memory_space<vmem>>, vector<32x32xf32>
    %cst = arith.constant dense<0.000000e+00> : vector<16x32xf32>
    %7 = tpu.matmul %5, %6, %cst {dimension_numbers = #tpu.dot_dimension_numbers<[1], [0], [0], [1], [0, 0, 1, 1], [], []>} : vector<16x32xf32>, vector<32x32xf32>, vector<16x32xf32> -> vector<16x32xf32>
    %c0_3 = arith.constant 0 : index
    %c0_4 = arith.constant 0 : index
    %8 = vector.load %arg2[%c0_3, %c0_4] : memref<32x96xf32, #tpu.memory_space<vmem>>, vector<32x96xf32>
    %cst_5 = arith.constant dense<0.000000e+00> : vector<16x96xf32>
    %9 = tpu.matmul %7, %8, %cst_5 {dimension_numbers = #tpu.dot_dimension_numbers<[1], [0], [0], [1], [0, 0, 1, 1], [], []>} : vector<16x32xf32>, vector<32x96xf32>, vector<16x96xf32> -> vector<16x96xf32>
    %c0_6 = arith.constant 0 : index
    %c0_7 = arith.constant 0 : index
    %10 = vector.load %arg3[%c0_6, %c0_7] : memref<1x96xf32, #tpu.memory_space<vmem>>, vector<1x96xf32>
    %11 = vector.broadcast %10 : vector<1x96xf32> to vector<16x96xf32>
    %12 = arith.addf %9, %11 : vector<16x96xf32>
    %c0_8 = arith.constant 0 : index
    %c0_9 = arith.constant 0 : index
    %13 = vector.load %arg4[%c0_8, %c0_9] : memref<32x96xf32, #tpu.memory_space<vmem>>, vector<32x96xf32>
    %c0_10 = arith.constant 0 : index
    %c0_11 = arith.constant 0 : index
    %14 = vector.load %arg5[%c0_10, %c0_11] : memref<1x96xf32, #tpu.memory_space<vmem>>, vector<1x96xf32>
    %cst_12 = arith.constant 0.000000e+00 : f32
    %15 = vector.broadcast %cst_12 : f32 to vector<2x32xf32>
    %16 = vector.extract_strided_slice %12 {offsets = [0, 0], sizes = [2, 96], strides = [1, 1]} : vector<16x96xf32> to vector<2x96xf32>
    %cst_13 = arith.constant dense<0.000000e+00> : vector<2x96xf32>
    %17 = tpu.matmul %15, %13, %cst_13 {dimension_numbers = #tpu.dot_dimension_numbers<[1], [0], [0], [1], [0, 0, 1, 1], [], []>} : vector<2x32xf32>, vector<32x96xf32>, vector<2x96xf32> -> vector<2x96xf32>
    %18 = vector.broadcast %14 : vector<1x96xf32> to vector<2x96xf32>
    %19 = arith.addf %17, %18 : vector<2x96xf32>
    %20 = vector.extract_strided_slice %16 {offsets = [0, 0], sizes = [2, 32], strides = [1, 1]} : vector<2x96xf32> to vector<2x32xf32>
    %21 = vector.extract_strided_slice %16 {offsets = [0, 32], sizes = [2, 32], strides = [1, 1]} : vector<2x96xf32> to vector<2x32xf32>
    %22 = vector.extract_strided_slice %16 {offsets = [0, 64], sizes = [2, 32], strides = [1, 1]} : vector<2x96xf32> to vector<2x32xf32>
    %23 = vector.extract_strided_slice %19 {offsets = [0, 0], sizes = [2, 32], strides = [1, 1]} : vector<2x96xf32> to vector<2x32xf32>
    %24 = vector.extract_strided_slice %19 {offsets = [0, 32], sizes = [2, 32], strides = [1, 1]} : vector<2x96xf32> to vector<2x32xf32>
    %25 = vector.extract_strided_slice %19 {offsets = [0, 64], sizes = [2, 32], strides = [1, 1]} : vector<2x96xf32> to vector<2x32xf32>
    %26 = arith.addf %20, %23 : vector<2x32xf32>
    %27 = arith.negf %26 : vector<2x32xf32>
    %28 = math.exp %27 : vector<2x32xf32>
    %cst_14 = arith.constant 1.000000e+00 : f32
    %29 = vector.broadcast %cst_14 : f32 to vector<2x32xf32>
    %30 = arith.addf %29, %28 : vector<2x32xf32>
    %31 = arith.divf %29, %30 : vector<2x32xf32>
    %32 = arith.addf %21, %24 : vector<2x32xf32>
    %33 = arith.negf %32 : vector<2x32xf32>
    %34 = math.exp %33 : vector<2x32xf32>
    %cst_15 = arith.constant 1.000000e+00 : f32
    %35 = vector.broadcast %cst_15 : f32 to vector<2x32xf32>
    %36 = arith.addf %35, %34 : vector<2x32xf32>
    %37 = arith.divf %35, %36 : vector<2x32xf32>
    %38 = arith.mulf %31, %25 : vector<2x32xf32>
    %39 = arith.addf %22, %38 : vector<2x32xf32>
    %40 = math.tanh %39 : vector<2x32xf32>
    %cst_16 = arith.constant 1.000000e+00 : f32
    %41 = vector.broadcast %cst_16 : f32 to vector<2x32xf32>
    %42 = arith.subf %41, %37 : vector<2x32xf32>
    %43 = arith.mulf %42, %40 : vector<2x32xf32>
    %44 = arith.mulf %37, %15 : vector<2x32xf32>
    %45 = arith.addf %43, %44 : vector<2x32xf32>
    %46 = vector.extract_strided_slice %12 {offsets = [2, 0], sizes = [2, 96], strides = [1, 1]} : vector<16x96xf32> to vector<2x96xf32>
    %cst_17 = arith.constant dense<0.000000e+00> : vector<2x96xf32>
    %47 = tpu.matmul %45, %13, %cst_17 {dimension_numbers = #tpu.dot_dimension_numbers<[1], [0], [0], [1], [0, 0, 1, 1], [], []>} : vector<2x32xf32>, vector<32x96xf32>, vector<2x96xf32> -> vector<2x96xf32>
    %48 = vector.broadcast %14 : vector<1x96xf32> to vector<2x96xf32>
    %49 = arith.addf %47, %48 : vector<2x96xf32>
    %50 = vector.extract_strided_slice %46 {offsets = [0, 0], sizes = [2, 32], strides = [1, 1]} : vector<2x96xf32> to vector<2x32xf32>
    %51 = vector.extract_strided_slice %46 {offsets = [0, 32], sizes = [2, 32], strides = [1, 1]} : vector<2x96xf32> to vector<2x32xf32>
    %52 = vector.extract_strided_slice %46 {offsets = [0, 64], sizes = [2, 32], strides = [1, 1]} : vector<2x96xf32> to vector<2x32xf32>
    %53 = vector.extract_strided_slice %49 {offsets = [0, 0], sizes = [2, 32], strides = [1, 1]} : vector<2x96xf32> to vector<2x32xf32>
    %54 = vector.extract_strided_slice %49 {offsets = [0, 32], sizes = [2, 32], strides = [1, 1]} : vector<2x96xf32> to vector<2x32xf32>
    %55 = vector.extract_strided_slice %49 {offsets = [0, 64], sizes = [2, 32], strides = [1, 1]} : vector<2x96xf32> to vector<2x32xf32>
    %56 = arith.addf %50, %53 : vector<2x32xf32>
    %57 = arith.negf %56 : vector<2x32xf32>
    %58 = math.exp %57 : vector<2x32xf32>
    %cst_18 = arith.constant 1.000000e+00 : f32
    %59 = vector.broadcast %cst_18 : f32 to vector<2x32xf32>
    %60 = arith.addf %59, %58 : vector<2x32xf32>
    %61 = arith.divf %59, %60 : vector<2x32xf32>
    %62 = arith.addf %51, %54 : vector<2x32xf32>
    %63 = arith.negf %62 : vector<2x32xf32>
    %64 = math.exp %63 : vector<2x32xf32>
    %cst_19 = arith.constant 1.000000e+00 : f32
    %65 = vector.broadcast %cst_19 : f32 to vector<2x32xf32>
    %66 = arith.addf %65, %64 : vector<2x32xf32>
    %67 = arith.divf %65, %66 : vector<2x32xf32>
    %68 = arith.mulf %61, %55 : vector<2x32xf32>
    %69 = arith.addf %52, %68 : vector<2x32xf32>
    %70 = math.tanh %69 : vector<2x32xf32>
    %cst_20 = arith.constant 1.000000e+00 : f32
    %71 = vector.broadcast %cst_20 : f32 to vector<2x32xf32>
    %72 = arith.subf %71, %67 : vector<2x32xf32>
    %73 = arith.mulf %72, %70 : vector<2x32xf32>
    %74 = arith.mulf %67, %45 : vector<2x32xf32>
    %75 = arith.addf %73, %74 : vector<2x32xf32>
    %76 = vector.extract_strided_slice %12 {offsets = [4, 0], sizes = [2, 96], strides = [1, 1]} : vector<16x96xf32> to vector<2x96xf32>
    %cst_21 = arith.constant dense<0.000000e+00> : vector<2x96xf32>
    %77 = tpu.matmul %75, %13, %cst_21 {dimension_numbers = #tpu.dot_dimension_numbers<[1], [0], [0], [1], [0, 0, 1, 1], [], []>} : vector<2x32xf32>, vector<32x96xf32>, vector<2x96xf32> -> vector<2x96xf32>
    %78 = vector.broadcast %14 : vector<1x96xf32> to vector<2x96xf32>
    %79 = arith.addf %77, %78 : vector<2x96xf32>
    %80 = vector.extract_strided_slice %76 {offsets = [0, 0], sizes = [2, 32], strides = [1, 1]} : vector<2x96xf32> to vector<2x32xf32>
    %81 = vector.extract_strided_slice %76 {offsets = [0, 32], sizes = [2, 32], strides = [1, 1]} : vector<2x96xf32> to vector<2x32xf32>
    %82 = vector.extract_strided_slice %76 {offsets = [0, 64], sizes = [2, 32], strides = [1, 1]} : vector<2x96xf32> to vector<2x32xf32>
    %83 = vector.extract_strided_slice %79 {offsets = [0, 0], sizes = [2, 32], strides = [1, 1]} : vector<2x96xf32> to vector<2x32xf32>
    %84 = vector.extract_strided_slice %79 {offsets = [0, 32], sizes = [2, 32], strides = [1, 1]} : vector<2x96xf32> to vector<2x32xf32>
    %85 = vector.extract_strided_slice %79 {offsets = [0, 64], sizes = [2, 32], strides = [1, 1]} : vector<2x96xf32> to vector<2x32xf32>
    %86 = arith.addf %80, %83 : vector<2x32xf32>
    %87 = arith.negf %86 : vector<2x32xf32>
    %88 = math.exp %87 : vector<2x32xf32>
    %cst_22 = arith.constant 1.000000e+00 : f32
    %89 = vector.broadcast %cst_22 : f32 to vector<2x32xf32>
    %90 = arith.addf %89, %88 : vector<2x32xf32>
    %91 = arith.divf %89, %90 : vector<2x32xf32>
    %92 = arith.addf %81, %84 : vector<2x32xf32>
    %93 = arith.negf %92 : vector<2x32xf32>
    %94 = math.exp %93 : vector<2x32xf32>
    %cst_23 = arith.constant 1.000000e+00 : f32
    %95 = vector.broadcast %cst_23 : f32 to vector<2x32xf32>
    %96 = arith.addf %95, %94 : vector<2x32xf32>
    %97 = arith.divf %95, %96 : vector<2x32xf32>
    %98 = arith.mulf %91, %85 : vector<2x32xf32>
    %99 = arith.addf %82, %98 : vector<2x32xf32>
    %100 = math.tanh %99 : vector<2x32xf32>
    %cst_24 = arith.constant 1.000000e+00 : f32
    %101 = vector.broadcast %cst_24 : f32 to vector<2x32xf32>
    %102 = arith.subf %101, %97 : vector<2x32xf32>
    %103 = arith.mulf %102, %100 : vector<2x32xf32>
    %104 = arith.mulf %97, %75 : vector<2x32xf32>
    %105 = arith.addf %103, %104 : vector<2x32xf32>
    %106 = vector.extract_strided_slice %12 {offsets = [6, 0], sizes = [2, 96], strides = [1, 1]} : vector<16x96xf32> to vector<2x96xf32>
    %cst_25 = arith.constant dense<0.000000e+00> : vector<2x96xf32>
    %107 = tpu.matmul %105, %13, %cst_25 {dimension_numbers = #tpu.dot_dimension_numbers<[1], [0], [0], [1], [0, 0, 1, 1], [], []>} : vector<2x32xf32>, vector<32x96xf32>, vector<2x96xf32> -> vector<2x96xf32>
    %108 = vector.broadcast %14 : vector<1x96xf32> to vector<2x96xf32>
    %109 = arith.addf %107, %108 : vector<2x96xf32>
    %110 = vector.extract_strided_slice %106 {offsets = [0, 0], sizes = [2, 32], strides = [1, 1]} : vector<2x96xf32> to vector<2x32xf32>
    %111 = vector.extract_strided_slice %106 {offsets = [0, 32], sizes = [2, 32], strides = [1, 1]} : vector<2x96xf32> to vector<2x32xf32>
    %112 = vector.extract_strided_slice %106 {offsets = [0, 64], sizes = [2, 32], strides = [1, 1]} : vector<2x96xf32> to vector<2x32xf32>
    %113 = vector.extract_strided_slice %109 {offsets = [0, 0], sizes = [2, 32], strides = [1, 1]} : vector<2x96xf32> to vector<2x32xf32>
    %114 = vector.extract_strided_slice %109 {offsets = [0, 32], sizes = [2, 32], strides = [1, 1]} : vector<2x96xf32> to vector<2x32xf32>
    %115 = vector.extract_strided_slice %109 {offsets = [0, 64], sizes = [2, 32], strides = [1, 1]} : vector<2x96xf32> to vector<2x32xf32>
    %116 = arith.addf %110, %113 : vector<2x32xf32>
    %117 = arith.negf %116 : vector<2x32xf32>
    %118 = math.exp %117 : vector<2x32xf32>
    %cst_26 = arith.constant 1.000000e+00 : f32
    %119 = vector.broadcast %cst_26 : f32 to vector<2x32xf32>
    %120 = arith.addf %119, %118 : vector<2x32xf32>
    %121 = arith.divf %119, %120 : vector<2x32xf32>
    %122 = arith.addf %111, %114 : vector<2x32xf32>
    %123 = arith.negf %122 : vector<2x32xf32>
    %124 = math.exp %123 : vector<2x32xf32>
    %cst_27 = arith.constant 1.000000e+00 : f32
    %125 = vector.broadcast %cst_27 : f32 to vector<2x32xf32>
    %126 = arith.addf %125, %124 : vector<2x32xf32>
    %127 = arith.divf %125, %126 : vector<2x32xf32>
    %128 = arith.mulf %121, %115 : vector<2x32xf32>
    %129 = arith.addf %112, %128 : vector<2x32xf32>
    %130 = math.tanh %129 : vector<2x32xf32>
    %cst_28 = arith.constant 1.000000e+00 : f32
    %131 = vector.broadcast %cst_28 : f32 to vector<2x32xf32>
    %132 = arith.subf %131, %127 : vector<2x32xf32>
    %133 = arith.mulf %132, %130 : vector<2x32xf32>
    %134 = arith.mulf %127, %105 : vector<2x32xf32>
    %135 = arith.addf %133, %134 : vector<2x32xf32>
    %136 = vector.extract_strided_slice %12 {offsets = [8, 0], sizes = [2, 96], strides = [1, 1]} : vector<16x96xf32> to vector<2x96xf32>
    %cst_29 = arith.constant dense<0.000000e+00> : vector<2x96xf32>
    %137 = tpu.matmul %135, %13, %cst_29 {dimension_numbers = #tpu.dot_dimension_numbers<[1], [0], [0], [1], [0, 0, 1, 1], [], []>} : vector<2x32xf32>, vector<32x96xf32>, vector<2x96xf32> -> vector<2x96xf32>
    %138 = vector.broadcast %14 : vector<1x96xf32> to vector<2x96xf32>
    %139 = arith.addf %137, %138 : vector<2x96xf32>
    %140 = vector.extract_strided_slice %136 {offsets = [0, 0], sizes = [2, 32], strides = [1, 1]} : vector<2x96xf32> to vector<2x32xf32>
    %141 = vector.extract_strided_slice %136 {offsets = [0, 32], sizes = [2, 32], strides = [1, 1]} : vector<2x96xf32> to vector<2x32xf32>
    %142 = vector.extract_strided_slice %136 {offsets = [0, 64], sizes = [2, 32], strides = [1, 1]} : vector<2x96xf32> to vector<2x32xf32>
    %143 = vector.extract_strided_slice %139 {offsets = [0, 0], sizes = [2, 32], strides = [1, 1]} : vector<2x96xf32> to vector<2x32xf32>
    %144 = vector.extract_strided_slice %139 {offsets = [0, 32], sizes = [2, 32], strides = [1, 1]} : vector<2x96xf32> to vector<2x32xf32>
    %145 = vector.extract_strided_slice %139 {offsets = [0, 64], sizes = [2, 32], strides = [1, 1]} : vector<2x96xf32> to vector<2x32xf32>
    %146 = arith.addf %140, %143 : vector<2x32xf32>
    %147 = arith.negf %146 : vector<2x32xf32>
    %148 = math.exp %147 : vector<2x32xf32>
    %cst_30 = arith.constant 1.000000e+00 : f32
    %149 = vector.broadcast %cst_30 : f32 to vector<2x32xf32>
    %150 = arith.addf %149, %148 : vector<2x32xf32>
    %151 = arith.divf %149, %150 : vector<2x32xf32>
    %152 = arith.addf %141, %144 : vector<2x32xf32>
    %153 = arith.negf %152 : vector<2x32xf32>
    %154 = math.exp %153 : vector<2x32xf32>
    %cst_31 = arith.constant 1.000000e+00 : f32
    %155 = vector.broadcast %cst_31 : f32 to vector<2x32xf32>
    %156 = arith.addf %155, %154 : vector<2x32xf32>
    %157 = arith.divf %155, %156 : vector<2x32xf32>
    %158 = arith.mulf %151, %145 : vector<2x32xf32>
    %159 = arith.addf %142, %158 : vector<2x32xf32>
    %160 = math.tanh %159 : vector<2x32xf32>
    %cst_32 = arith.constant 1.000000e+00 : f32
    %161 = vector.broadcast %cst_32 : f32 to vector<2x32xf32>
    %162 = arith.subf %161, %157 : vector<2x32xf32>
    %163 = arith.mulf %162, %160 : vector<2x32xf32>
    %164 = arith.mulf %157, %135 : vector<2x32xf32>
    %165 = arith.addf %163, %164 : vector<2x32xf32>
    %166 = vector.extract_strided_slice %12 {offsets = [10, 0], sizes = [2, 96], strides = [1, 1]} : vector<16x96xf32> to vector<2x96xf32>
    %cst_33 = arith.constant dense<0.000000e+00> : vector<2x96xf32>
    %167 = tpu.matmul %165, %13, %cst_33 {dimension_numbers = #tpu.dot_dimension_numbers<[1], [0], [0], [1], [0, 0, 1, 1], [], []>} : vector<2x32xf32>, vector<32x96xf32>, vector<2x96xf32> -> vector<2x96xf32>
    %168 = vector.broadcast %14 : vector<1x96xf32> to vector<2x96xf32>
    %169 = arith.addf %167, %168 : vector<2x96xf32>
    %170 = vector.extract_strided_slice %166 {offsets = [0, 0], sizes = [2, 32], strides = [1, 1]} : vector<2x96xf32> to vector<2x32xf32>
    %171 = vector.extract_strided_slice %166 {offsets = [0, 32], sizes = [2, 32], strides = [1, 1]} : vector<2x96xf32> to vector<2x32xf32>
    %172 = vector.extract_strided_slice %166 {offsets = [0, 64], sizes = [2, 32], strides = [1, 1]} : vector<2x96xf32> to vector<2x32xf32>
    %173 = vector.extract_strided_slice %169 {offsets = [0, 0], sizes = [2, 32], strides = [1, 1]} : vector<2x96xf32> to vector<2x32xf32>
    %174 = vector.extract_strided_slice %169 {offsets = [0, 32], sizes = [2, 32], strides = [1, 1]} : vector<2x96xf32> to vector<2x32xf32>
    %175 = vector.extract_strided_slice %169 {offsets = [0, 64], sizes = [2, 32], strides = [1, 1]} : vector<2x96xf32> to vector<2x32xf32>
    %176 = arith.addf %170, %173 : vector<2x32xf32>
    %177 = arith.negf %176 : vector<2x32xf32>
    %178 = math.exp %177 : vector<2x32xf32>
    %cst_34 = arith.constant 1.000000e+00 : f32
    %179 = vector.broadcast %cst_34 : f32 to vector<2x32xf32>
    %180 = arith.addf %179, %178 : vector<2x32xf32>
    %181 = arith.divf %179, %180 : vector<2x32xf32>
    %182 = arith.addf %171, %174 : vector<2x32xf32>
    %183 = arith.negf %182 : vector<2x32xf32>
    %184 = math.exp %183 : vector<2x32xf32>
    %cst_35 = arith.constant 1.000000e+00 : f32
    %185 = vector.broadcast %cst_35 : f32 to vector<2x32xf32>
    %186 = arith.addf %185, %184 : vector<2x32xf32>
    %187 = arith.divf %185, %186 : vector<2x32xf32>
    %188 = arith.mulf %181, %175 : vector<2x32xf32>
    %189 = arith.addf %172, %188 : vector<2x32xf32>
    %190 = math.tanh %189 : vector<2x32xf32>
    %cst_36 = arith.constant 1.000000e+00 : f32
    %191 = vector.broadcast %cst_36 : f32 to vector<2x32xf32>
    %192 = arith.subf %191, %187 : vector<2x32xf32>
    %193 = arith.mulf %192, %190 : vector<2x32xf32>
    %194 = arith.mulf %187, %165 : vector<2x32xf32>
    %195 = arith.addf %193, %194 : vector<2x32xf32>
    %196 = vector.extract_strided_slice %12 {offsets = [12, 0], sizes = [2, 96], strides = [1, 1]} : vector<16x96xf32> to vector<2x96xf32>
    %cst_37 = arith.constant dense<0.000000e+00> : vector<2x96xf32>
    %197 = tpu.matmul %195, %13, %cst_37 {dimension_numbers = #tpu.dot_dimension_numbers<[1], [0], [0], [1], [0, 0, 1, 1], [], []>} : vector<2x32xf32>, vector<32x96xf32>, vector<2x96xf32> -> vector<2x96xf32>
    %198 = vector.broadcast %14 : vector<1x96xf32> to vector<2x96xf32>
    %199 = arith.addf %197, %198 : vector<2x96xf32>
    %200 = vector.extract_strided_slice %196 {offsets = [0, 0], sizes = [2, 32], strides = [1, 1]} : vector<2x96xf32> to vector<2x32xf32>
    %201 = vector.extract_strided_slice %196 {offsets = [0, 32], sizes = [2, 32], strides = [1, 1]} : vector<2x96xf32> to vector<2x32xf32>
    %202 = vector.extract_strided_slice %196 {offsets = [0, 64], sizes = [2, 32], strides = [1, 1]} : vector<2x96xf32> to vector<2x32xf32>
    %203 = vector.extract_strided_slice %199 {offsets = [0, 0], sizes = [2, 32], strides = [1, 1]} : vector<2x96xf32> to vector<2x32xf32>
    %204 = vector.extract_strided_slice %199 {offsets = [0, 32], sizes = [2, 32], strides = [1, 1]} : vector<2x96xf32> to vector<2x32xf32>
    %205 = vector.extract_strided_slice %199 {offsets = [0, 64], sizes = [2, 32], strides = [1, 1]} : vector<2x96xf32> to vector<2x32xf32>
    %206 = arith.addf %200, %203 : vector<2x32xf32>
    %207 = arith.negf %206 : vector<2x32xf32>
    %208 = math.exp %207 : vector<2x32xf32>
    %cst_38 = arith.constant 1.000000e+00 : f32
    %209 = vector.broadcast %cst_38 : f32 to vector<2x32xf32>
    %210 = arith.addf %209, %208 : vector<2x32xf32>
    %211 = arith.divf %209, %210 : vector<2x32xf32>
    %212 = arith.addf %201, %204 : vector<2x32xf32>
    %213 = arith.negf %212 : vector<2x32xf32>
    %214 = math.exp %213 : vector<2x32xf32>
    %cst_39 = arith.constant 1.000000e+00 : f32
    %215 = vector.broadcast %cst_39 : f32 to vector<2x32xf32>
    %216 = arith.addf %215, %214 : vector<2x32xf32>
    %217 = arith.divf %215, %216 : vector<2x32xf32>
    %218 = arith.mulf %211, %205 : vector<2x32xf32>
    %219 = arith.addf %202, %218 : vector<2x32xf32>
    %220 = math.tanh %219 : vector<2x32xf32>
    %cst_40 = arith.constant 1.000000e+00 : f32
    %221 = vector.broadcast %cst_40 : f32 to vector<2x32xf32>
    %222 = arith.subf %221, %217 : vector<2x32xf32>
    %223 = arith.mulf %222, %220 : vector<2x32xf32>
    %224 = arith.mulf %217, %195 : vector<2x32xf32>
    %225 = arith.addf %223, %224 : vector<2x32xf32>
    %226 = vector.extract_strided_slice %12 {offsets = [14, 0], sizes = [2, 96], strides = [1, 1]} : vector<16x96xf32> to vector<2x96xf32>
    %cst_41 = arith.constant dense<0.000000e+00> : vector<2x96xf32>
    %227 = tpu.matmul %225, %13, %cst_41 {dimension_numbers = #tpu.dot_dimension_numbers<[1], [0], [0], [1], [0, 0, 1, 1], [], []>} : vector<2x32xf32>, vector<32x96xf32>, vector<2x96xf32> -> vector<2x96xf32>
    %228 = vector.broadcast %14 : vector<1x96xf32> to vector<2x96xf32>
    %229 = arith.addf %227, %228 : vector<2x96xf32>
    %230 = vector.extract_strided_slice %226 {offsets = [0, 0], sizes = [2, 32], strides = [1, 1]} : vector<2x96xf32> to vector<2x32xf32>
    %231 = vector.extract_strided_slice %226 {offsets = [0, 32], sizes = [2, 32], strides = [1, 1]} : vector<2x96xf32> to vector<2x32xf32>
    %232 = vector.extract_strided_slice %226 {offsets = [0, 64], sizes = [2, 32], strides = [1, 1]} : vector<2x96xf32> to vector<2x32xf32>
    %233 = vector.extract_strided_slice %229 {offsets = [0, 0], sizes = [2, 32], strides = [1, 1]} : vector<2x96xf32> to vector<2x32xf32>
    %234 = vector.extract_strided_slice %229 {offsets = [0, 32], sizes = [2, 32], strides = [1, 1]} : vector<2x96xf32> to vector<2x32xf32>
    %235 = vector.extract_strided_slice %229 {offsets = [0, 64], sizes = [2, 32], strides = [1, 1]} : vector<2x96xf32> to vector<2x32xf32>
    %236 = arith.addf %230, %233 : vector<2x32xf32>
    %237 = arith.negf %236 : vector<2x32xf32>
    %238 = math.exp %237 : vector<2x32xf32>
    %cst_42 = arith.constant 1.000000e+00 : f32
    %239 = vector.broadcast %cst_42 : f32 to vector<2x32xf32>
    %240 = arith.addf %239, %238 : vector<2x32xf32>
    %241 = arith.divf %239, %240 : vector<2x32xf32>
    %242 = arith.addf %231, %234 : vector<2x32xf32>
    %243 = arith.negf %242 : vector<2x32xf32>
    %244 = math.exp %243 : vector<2x32xf32>
    %cst_43 = arith.constant 1.000000e+00 : f32
    %245 = vector.broadcast %cst_43 : f32 to vector<2x32xf32>
    %246 = arith.addf %245, %244 : vector<2x32xf32>
    %247 = arith.divf %245, %246 : vector<2x32xf32>
    %248 = arith.mulf %241, %235 : vector<2x32xf32>
    %249 = arith.addf %232, %248 : vector<2x32xf32>
    %250 = math.tanh %249 : vector<2x32xf32>
    %cst_44 = arith.constant 1.000000e+00 : f32
    %251 = vector.broadcast %cst_44 : f32 to vector<2x32xf32>
    %252 = arith.subf %251, %247 : vector<2x32xf32>
    %253 = arith.mulf %252, %250 : vector<2x32xf32>
    %254 = arith.mulf %247, %225 : vector<2x32xf32>
    %255 = arith.addf %253, %254 : vector<2x32xf32>
    %c0_45 = arith.constant 0 : index
    %c0_46 = arith.constant 0 : index
    %256 = vector.load %arg6[%c0_45, %c0_46] : memref<32x16xf32, #tpu.memory_space<vmem>>, vector<32x16xf32>
    %cst_47 = arith.constant dense<0.000000e+00> : vector<2x16xf32>
    %257 = tpu.matmul %255, %256, %cst_47 {dimension_numbers = #tpu.dot_dimension_numbers<[1], [0], [0], [1], [0, 0, 1, 1], [], []>} : vector<2x32xf32>, vector<32x16xf32>, vector<2x16xf32> -> vector<2x16xf32>
    %c0_48 = arith.constant 0 : index
    %c0_49 = arith.constant 0 : index
    %258 = vector.load %arg7[%c0_48, %c0_49] : memref<1x16xf32, #tpu.memory_space<vmem>>, vector<1x16xf32>
    %259 = vector.broadcast %258 : vector<1x16xf32> to vector<2x16xf32>
    %260 = arith.addf %257, %259 : vector<2x16xf32>
    %c0_50 = arith.constant 0 : index
    %c0_51 = arith.constant 0 : index
    %261 = vector.load %arg8[%c0_50, %c0_51] : memref<32x16xf32, #tpu.memory_space<vmem>>, vector<32x16xf32>
    %cst_52 = arith.constant dense<0.000000e+00> : vector<2x16xf32>
    %262 = tpu.matmul %255, %261, %cst_52 {dimension_numbers = #tpu.dot_dimension_numbers<[1], [0], [0], [1], [0, 0, 1, 1], [], []>} : vector<2x32xf32>, vector<32x16xf32>, vector<2x16xf32> -> vector<2x16xf32>
    %c0_53 = arith.constant 0 : index
    %c0_54 = arith.constant 0 : index
    %263 = vector.load %arg9[%c0_53, %c0_54] : memref<1x16xf32, #tpu.memory_space<vmem>>, vector<1x16xf32>
    %264 = vector.broadcast %263 : vector<1x16xf32> to vector<2x16xf32>
    %265 = arith.addf %262, %264 : vector<2x16xf32>
    %cst_55 = arith.constant 5.000000e-01 : f32
    %266 = vector.broadcast %cst_55 : f32 to vector<2x16xf32>
    %267 = arith.mulf %266, %265 : vector<2x16xf32>
    %268 = math.exp %267 : vector<2x16xf32>
    %c0_56 = arith.constant 0 : index
    %c0_57 = arith.constant 0 : index
    %269 = vector.load %arg10[%c0_56, %c0_57] : memref<2x16xf32, #tpu.memory_space<vmem>>, vector<2x16xf32>
    %270 = arith.mulf %268, %269 : vector<2x16xf32>
    %271 = arith.addf %260, %270 : vector<2x16xf32>
    %c0_58 = arith.constant 0 : index
    %c0_59 = arith.constant 0 : index
    %272 = vector.load %arg11[%c0_58, %c0_59] : memref<2x16xf32, #tpu.memory_space<vmem>>, vector<2x16xf32>
    tpu.vector_store %arg11[%c0_58, %c0_59], %271 {strides = array<i32>} : memref<2x16xf32, #tpu.memory_space<vmem>>, vector<2x16xf32>,
    %273 = math.exp %265 : vector<2x16xf32>
    %274 = arith.mulf %260, %260 : vector<2x16xf32>
    %275 = arith.addf %273, %274 : vector<2x16xf32>
    %cst_60 = arith.constant 1.000000e+00 : f32
    %276 = vector.broadcast %cst_60 : f32 to vector<2x16xf32>
    %277 = arith.subf %275, %276 : vector<2x16xf32>
    %278 = arith.subf %277, %265 : vector<2x16xf32>
    %cst_61 = arith.constant dense<0.000000e+00> : vector<2xf32>
    %279 = vector.multi_reduction <add>, %278, %cst_61 [1] : vector<2x16xf32> to vector<2xf32>
    %280 = vector.shape_cast %279 : vector<2xf32> to vector<2x1xf32>
    %cst_62 = arith.constant dense<0.000000e+00> : vector<1xf32>
    %281 = vector.multi_reduction <add>, %280, %cst_62 [0] : vector<2x1xf32> to vector<1xf32>
    %282 = vector.shape_cast %281 : vector<1xf32> to vector<1x1xf32>
    %cst_63 = arith.constant 2.000000e+00 : f32
    %283 = vector.broadcast %cst_63 : f32 to vector<1x1xf32>
    %284 = arith.divf %282, %283 : vector<1x1xf32>
    %cst_64 = arith.constant 5.000000e-01 : f32
    %285 = vector.broadcast %cst_64 : f32 to vector<1x1xf32>
    %286 = arith.mulf %285, %284 : vector<1x1xf32>
    %c0_65 = arith.constant 0 : index
    %c0_66 = arith.constant 0 : index
    %287 = vector.load %arg12[%c0_65, %c0_66] : memref<1x1xf32, #tpu.memory_space<vmem>>, vector<1x1xf32>
    tpu.vector_store %arg12[%c0_65, %c0_66], %286 {strides = array<i32>} : memref<1x1xf32, #tpu.memory_space<vmem>>, vector<1x1xf32>,
    return
  }
}

</mosaic_0001>

<bundles_post_ra>
// kernel: tpu_custom_call.1
= control target key start
LH: loop header
LB: loop body
LE: loop exit
PB: predicated region body
PF: predicated region fallthrough
CT: control target
= control target key end

     0   :  { %18 = vsyncpa [#allocation3], 0  ;;  %s2080_s0 = inlined_call_operand.vmem [shape: s32[16,1], index: 0, kind: input, shape index: {}]   ;;  %s2081_s1 = inlined_call_operand.vmem [shape: f32[32,32], index: 1, kind: input, shape index: {}]   ;;  %s2082_s2 = inlined_call_operand.vmem [shape: f32[32,96], index: 2, kind: input, shape index: {}]   ;;  %s2083_s3 = inlined_call_operand.hbm [shape: f32[1,96], index: 3, kind: input, shape index: {}]   ;;  %s2084_s4 = inlined_call_operand.vmem [shape: f32[32,96], index: 4, kind: input, shape index: {}]   ;;  %s2085_s5 = inlined_call_operand.vmem [shape: f32[1,96], index: 5, kind: input, shape index: {}]   ;;  %s2086_s6 = inlined_call_operand.vmem [shape: f32[32,16], index: 6, kind: input, shape index: {}]   ;;  %s2087_s7 = inlined_call_operand.vmem [shape: f32[1,16], index: 7, kind: input, shape index: {}]   ;;  %s2088_s8 = inlined_call_operand.vmem [shape: f32[32,16], index: 8, kind: input, shape index: {}]   ;;  %s2089_s9 = inlined_call_operand.vmem [shape: f32[1,16], index: 9, kind: input, shape index: {}]   ;;  %s2090_s10 = inlined_call_operand.vmem [shape: f32[2,16], index: 10, kind: input, shape index: {}]   ;;  %s2091_s11 = inlined_call_operand.hbm [shape: f32[2,16], index: 11, kind: output, shape index: {0}]   ;;  %s2092_s12 = inlined_call_operand.hbm [shape: f32[1,1], index: 12, kind: output, shape index: {1}]  }
   0x1   :  { %19 = vsyncpa [#allocation4], 0 }
   0x2   :  { %20 = vsyncpa [#allocation7], 0  ;;  %s1754_s21 = smov [#allocation2]   ;;  %s1682_s25 = scalar_lea.hbm %s2083_s3, 16 }
   0x3   :  { %s33_s22 = sshll.u32 %s1754_s21, 4  ;;  %p1683_p0 = scmp.ne.s32.totalorder %s2083_s3, %s1682_s25  ;;  %s34_s22 = int_to_ptr.vmem [resolvable:$true] %s33_s22 }
   0x4   :  { %p1686_p1 = scmp.lt.u32.totalorder %s1682_s25, %s2083_s3 }
   0x6   :  { %p1688_p2 = pnand %p1686_p1, %p1683_p0 }
   0x8   :  { %1691 = shalt.err (!%p1688_p2)
}
   0x9   :  { %s1692_s30 = scalar_lea.vmem %s34_s22, 16  ;;  %s1696_s13 = scalar_lea.vmem %s34_s22, 32 }
   0xa   :  { %p1693_p3 = scmp.ne.s32.totalorder %s34_s22, %s1692_s30  ;;  %p1697_p4 = scmp.lt.s32.totalorder %s34_s22, %s34_s22 }
   0xb   :  { %p1698_p5 = scmp.lt.s32.totalorder %s1696_s13, %s1692_s30 }
   0xd   :  { %p1699_p6 = por %p1698_p5, %p1697_p4 }
   0xf   :  { %p1700_p7 = pnand %p1699_p6, %p1693_p3 }
  0x11   :  { %1703 = shalt.err (!%p1700_p7)
}
  0x12   :  { %36 = dma.hbm_to_vmem [thread:$0]  %s2083_s3, 16, %s34_s22, [#allocation3]  }
  0x13   :  { %1748 = dma.done.wait [#allocation3], 16  }
  0x14   :  { %1749 = vsyncadd [#allocation3], 4294967280  ;;  %v1755_v0 = vmov 0   ;;  %v54_v1 = vld [vmem:[%s2080_s0] sm:$0xff]  ;;  %v71_v3 = vld [vmem:[%s2081_s1 + $0x8] sm:$0xff]  ;;  %v1756_v9 = vmov 0.0|0.0   ;;  %v56_v16 = vlaneseq }
  0x15   :  { %1629 = vset.pattern.permute.xlu0 %v1755_v0  ;;  %v70_v2 = vld [vmem:[%s2081_s1] sm:$0xff]  ;;  %v72_v4 = vld [vmem:[%s2081_s1 + $0x10] sm:$0xff]  ;;  %v73_v5 = vld [vmem:[%s2081_s1 + $0x18] sm:$0xff]  ;;  %vm74_vm0 = vcmask 261120   ;;  %v1757_v21 = vmov 0.0   ;;  %vm1758_vm3 = vmmov 0  }
  0x16   :  { %59 = vperm.xlu0 %1629, %v54_v1   ;;  %v55_v6 = vld [vmem:[%s2080_s0 + $0x8] sm:$0xff]  ;;  %v1544_v7 = vpack.c.bf16 %v71_v3, %v70_v2  ;;  %v1548_v8 = vpack.c.bf16 %v73_v5, %v72_v4  ;;  %v156_v10 = vld [vmem:[%s2082_s2] sm:$0xff]  ;;  %v158_v12 = vld [vmem:[%s2082_s2 + $0x10] sm:$0xff]  ;;  %v57_v17 = vand.u32 127, %v56_v16  ;;  %s1759_s24 = smov 64   ;;  %vm1269_vm4 = vcmask 123904  }
  0x17   :  { %v157_v11 = vld [vmem:[%s2082_s2 + $0x8] sm:$0xff]  ;;  %v159_v14 = vld [vmem:[%s2082_s2 + $0x18] sm:$0xff]  ;;  %v248_v19 = vld [vmem:[%s2084_s4] sm:$0xff] }
  0x18   :  { %1545 = vmatprep.subr.bf16.mxu0 %v1544_v7  ;;  %v1552_v13 = vpack.c.bf16 %v157_v11, %v156_v10  ;;  %v1556_v15 = vpack.c.bf16 %v159_v14, %v158_v12  ;;  %v249_v20 = vld [vmem:[%s2084_s4 + $0x8] sm:$0xff]  ;;  %v250_v25 = vld [vmem:[%s2084_s4 + $0x10] sm:$0xff]  ;;  %v251_v26 = vld [vmem:[%s2084_s4 + $0x18] sm:$0xff] }
  0x19   :  { %1547 = vmatpush3.bf16.msra.mxu0 %v1544_v7  ;;  %v1880_v24 = vpack.c.bf16 %v249_v20, %v248_v19  ;;  %v1891_v28 = vpack.c.bf16 %v251_v26, %v250_v25  ;;  %v1914_v31 = vld [vmem:[%s2085_s5] ss:$0 sm:$0xff]  ;;  %v1326_v35 = vld [vmem:[#allocation2] ss:$0 sm:$0xff]  ;;  %s1760_s5 = smov 96  }
  0x1a   :  { %62 = vperm.xlu0 %1629, %v55_v6   ;;  %1549 = vmatprep.subr.bf16.mxu0 %v1548_v8 }
  0x1b   :  { %1553 = vmatprep.subr.bf16.mxu1 %v1552_v13 }
  0x1c   :  { %1555 = vmatpush3.bf16.msra.mxu1 %v1552_v13 }
  0x1d   :  { %1551 = vmatpush3.bf16.msra.mxu0 %v1548_v8  ;;  %1557 = vmatprep.subr.bf16.mxu1 %v1556_v15 }
  0x1e   :  { %1560 = vmatprep.subr.bf16.mxu0 %v1756_v9 }
  0x20   :  { %1559 = vmatpush3.bf16.msra.mxu1 %v1556_v15 }
  0x21   :  { %1566 = vmatprep.subr.bf16.mxu1 %v1756_v9 }
  0x95   :  { %v60_v18 = vpop.permute.xlu0 %59 }
  0x96   :  { %vm64_vm1 = vcmp.eq.s32.totalorder %v60_v18, %v57_v17 }
  0x97   :  { %v1322_v22 = vsel %vm64_vm1, 1.0, %v1757_v21 }
  0x98   :  { %1420 = vmatprep.mubr.msk.f32.mxu0 %vm74_vm0, %v1322_v22 }
  0x99   :  { %v63_v23 = vpop.permute.xlu0 %62 }
  0x9a   :  { %vm65_vm2 = vcmp.eq.s32.totalorder %v63_v23, %v57_v17 }
  0x9b   :  { %v1323_v27 = vsel %vm65_vm2, 1.0, %v1757_v21 }
  0x9c   :  { %1421 = vmatmul.mubr.msk.f32.vlgmr.msra.gmra.mrb[0].mxu0 %vm74_vm0, %v1323_v27 }
  0x9d   :  { %1562 = vmatpush3.bf16.msra.mxu0 %v1880_v24  ;;  %1442 = vmatprep.mubr.msk.f32.mxu0 %vm1758_vm3, %v1757_v21 }
  0x9e   :  { %1563 = vmatprep.subr.bf16.mxu0 %v1756_v9 }
  0xa1   :  { %1565 = vmatpush3.bf16.msra.mxu0 %v1891_v28 }
  0xa2   :  { %1572 = vmatprep.subr.bf16.mxu0 %v1756_v9 }
  0xa4   :  { %1443 = vmatmul.mubr.f32.vlgmr.msra.gmra.mrb[2].mxu0 %v1757_v21 }
  0xa5   :  { %1574 = vmatpush3.bf16.msra.mxu0 %v1880_v24  ;;  %1464 = vmatprep.mubr.msk.f32.mxu0 %vm1758_vm3, %v1757_v21 }
  0xa6   :  { %1575 = vmatprep.subr.bf16.mxu0 %v1756_v9 }
  0xa9   :  { %1577 = vmatpush3.bf16.msra.mxu0 %v1891_v28 }
  0xaa   :  { %1584 = vmatprep.subr.bf16.mxu0 %v1756_v9 }
 0x16f   :  { %v1422_v29 = vpop.f32.mrb[0].mxu0 }
 0x170   :  { %v147_v30 = vpop.f32.mrb[1].mxu0 }
 0x171   :  { %1431 = vmatprep.mubr.msk.f32.mxu1 %vm74_vm0, %v147_v30 }
 0x172   :  { %1432 = vmatmul.mubr.msk.f32.vlgmr.msra.gmra.mrb[0].mxu1 %vm74_vm0, %v1422_v29 }
 0x173   :  { %1568 = vmatpush3.bf16.msra.mxu1 %v1880_v24  ;;  %1453 = vmatprep.mubr.msk.f32.mxu1 %vm1758_vm3, %v1757_v21 }
 0x174   :  { %1569 = vmatprep.subr.bf16.mxu1 %v1756_v9 }
 0x177   :  { %v328_v32 = vpop.f32.mrb[2].mxu0  ;;  %1571 = vmatpush3.bf16.msra.mxu1 %v1891_v28 }
 0x178   :  { %v329_v33 = vadd.f32 %v1914_v31, %v328_v32  ;;  %v1444_v34 = vpop.f32.mrb[3].mxu0  ;;  %1578 = vmatprep.subr.bf16.mxu1 %v1756_v9 }
 0x17a   :  { %340 = vrot.lane.b32.xlu1 %v329_v33, %s1759_s24 }
 0x1ec   :  { %v341_v44 = vpop.permute.xlu1 %340 }
 0x245   :  { %v1433_v36 = vpop.f32.mrb[0].mxu1 }
 0x246   :  { %v1920_v37 = vadd.f32 %v1433_v36, %v1326_v35  ;;  %v239_v38 = vpop.f32.mrb[1].mxu1 }
 0x247   :  { %v1922_v39 = vadd.f32 %v1326_v35, %v239_v38 }
 0x249   :  { %v332_v40 = vadd.f32 %v329_v33, %v1922_v39 }
 0x24b   :  { %v1330_v41 = vmul.f32 -1.442695, %v332_v40 }
 0x24d   :  { %1630 = vpow2.f32 %v1330_v41 }
 0x257   :  { %v1631_v42 = vpop.eup %1630 }
 0x258   :  { %v336_v43 = vadd.f32 1.0, %v1631_v42 }
 0x25a   :  { %1632 = vrcp.f32 %v336_v43 }
 0x264   :  { %v1633_v45 = vpop.eup %1632 }
 0x265   :  { %v343_v46 = vmul.f32 %v1633_v45, %v341_v44  ;;  %v350_v50 = vsub.f32 1.0, %v1633_v45  ;;  %v356_v52 = vmul.f32 0.0, %v1633_v45 }
 0x267   :  { %345 = vrot.lane.b32.xlu1 %v343_v46, %s1759_s24 }
 0x2d9   :  { %v346_v47 = vpop.permute.xlu1 %345 }
 0x2da   :  { %v348_v48 = vadd.f32 %v346_v47, %v1922_v39 }
 0x2dc   :  { %1634 = vtanh.f32 %v348_v48 }
 0x2e6   :  { %v1635_v49 = vpop.eup %1634 }
 0x2e7   :  { %352 = vrot.lane.b32.xlu0 %v1635_v49, %s1760_s5 }
 0x359   :  { %v353_v51 = vpop.permute.xlu0 %352 }
 0x35a   :  { %v355_v53 = vmul.f32 %v353_v51, %v350_v50 }
 0x35c   :  { %v357_v54 = vadd.f32 %v356_v52, %v355_v53 }
 0x35e   :  { %359 = vrot.lane.b32.xlu1 %v357_v54, %s1760_s5  ;;  %v459_v6 = vrot.slane %v357_v54, 6 }
 0x3d0   :  { %v360_v55 = vpop.permute.xlu1 %359 }
 0x3d1   :  { %1454 = vmatmul.mubr.msk.f32.vlgmr.msra.gmra.mrb[2].mxu1 %vm74_vm0, %v360_v55 }
 0x3d2   :  { %1580 = vmatpush3.bf16.msra.mxu1 %v1880_v24  ;;  %1475 = vmatprep.mubr.msk.f32.mxu1 %vm1758_vm3, %v1757_v21 }
 0x3d3   :  { %1581 = vmatprep.subr.bf16.mxu1 %v1756_v9 }
 0x3d6   :  { %1583 = vmatpush3.bf16.msra.mxu1 %v1891_v28 }
 0x3d7   :  { %1590 = vmatprep.subr.bf16.mxu1 %v1756_v9 }
 0x4a4   :  { %v429_v56 = vpop.f32.mrb[2].mxu1 }
 0x4a5   :  { %v430_v57 = vadd.f32 %v1914_v31, %v429_v56  ;;  %v1455_v58 = vpop.f32.mrb[3].mxu1 }
 0x4a7   :  { %v434_v59 = vrot.slane %v430_v57, 6 }
 0x4a9   :  { %443 = vrot.lane.b32.xlu0 %v434_v59, %s1759_s24  ;;  %v436_v60 = vadd.f32 %v434_v59, %v1922_v39 }
 0x4ab   :  { %v1332_v61 = vmul.f32 -1.442695, %v436_v60 }
 0x4ad   :  { %1636 = vpow2.f32 %v1332_v61 }
 0x4b7   :  { %v1637_v62 = vpop.eup %1636 }
 0x4b8   :  { %v440_v63 = vadd.f32 1.0, %v1637_v62 }
 0x4ba   :  { %1638 = vrcp.f32 %v440_v63 }
 0x4c4   :  { %v1639_v0 = vpop.eup %1638 }
 0x4c5   :  { %v453_v7 = vsub.f32 1.0, %v1639_v0  ;;  %v461_v11 = vmul.f32 %v1639_v0, %v459_v6 }
 0x51b   :  { %v444_v1 = vpop.permute.xlu0 %443 }
 0x51c   :  { %v446_v2 = vmul.f32 %v1639_v0, %v444_v1 }
 0x51e   :  { %448 = vrot.lane.b32.xlu1 %v446_v2, %s1759_s24 }
 0x590   :  { %v449_v3 = vpop.permute.xlu1 %448 }
 0x591   :  { %v451_v4 = vadd.f32 %v449_v3, %v1922_v39 }
 0x593   :  { %1640 = vtanh.f32 %v451_v4 }
 0x59d   :  { %v1641_v5 = vpop.eup %1640 }
 0x59e   :  { %455 = vrot.lane.b32.xlu0 %v1641_v5, %s1760_s5 }
 0x610   :  { %v456_v8 = vpop.permute.xlu0 %455 }
 0x611   :  { %v458_v10 = vmul.f32 %v456_v8, %v453_v7 }
 0x613   :  { %v462_v12 = vadd.f32 %v461_v11, %v458_v10 }
 0x615   :  { %v464_v13 = vrot.slane %v462_v12, 2  ;;  %v565_v33 = vrot.slane %v462_v12, 6 }
 0x617   :  { %465 = vrot.lane.b32.xlu1 %v464_v13, %s1760_s5 }
 0x689   :  { %v466_v14 = vpop.permute.xlu1 %465 }
 0x68a   :  { %1465 = vmatmul.mubr.msk.f32.vlgmr.msra.gmra.mrb[4].mxu0 %vm74_vm0, %v466_v14 }
 0x68b   :  { %1586 = vmatpush3.bf16.msra.mxu0 %v1880_v24  ;;  %1486 = vmatprep.mubr.msk.f32.mxu0 %vm1758_vm3, %v1757_v21 }
 0x68c   :  { %1587 = vmatprep.subr.bf16.mxu0 %v1756_v9 }
 0x68f   :  { %1589 = vmatpush3.bf16.msra.mxu0 %v1891_v28 }
 0x690   :  { %1596 = vmatprep.subr.bf16.mxu0 %v1756_v9 }
 0x75d   :  { %v535_v15 = vpop.f32.mrb[4].mxu0 }
 0x75e   :  { %v536_v16 = vadd.f32 %v1914_v31, %v535_v15  ;;  %v1466_v17 = vpop.f32.mrb[5].mxu0 }
 0x760   :  { %v540_v18 = vrot.slane %v536_v16, 4 }
 0x762   :  { %549 = vrot.lane.b32.xlu0 %v540_v18, %s1759_s24  ;;  %v542_v19 = vadd.f32 %v540_v18, %v1922_v39 }
 0x764   :  { %v1334_v20 = vmul.f32 -1.442695, %v542_v19 }
 0x766   :  { %1642 = vpow2.f32 %v1334_v20 }
 0x770   :  { %v1643_v22 = vpop.eup %1642 }
 0x771   :  { %v546_v23 = vadd.f32 1.0, %v1643_v22 }
 0x773   :  { %1644 = vrcp.f32 %v546_v23 }
 0x77d   :  { %v1645_v25 = vpop.eup %1644 }
 0x77e   :  { %v559_v34 = vsub.f32 1.0, %v1645_v25  ;;  %v567_v36 = vmul.f32 %v1645_v25, %v565_v33 }
 0x7d4   :  { %v550_v26 = vpop.permute.xlu0 %549 }
 0x7d5   :  { %v552_v27 = vmul.f32 %v1645_v25, %v550_v26 }
 0x7d7   :  { %554 = vrot.lane.b32.xlu1 %v552_v27, %s1759_s24 }
 0x849   :  { %v555_v29 = vpop.permute.xlu1 %554 }
 0x84a   :  { %v557_v30 = vadd.f32 %v555_v29, %v1922_v39 }
 0x84c   :  { %1646 = vtanh.f32 %v557_v30 }
 0x856   :  { %v1647_v32 = vpop.eup %1646 }
 0x857   :  { %561 = vrot.lane.b32.xlu0 %v1647_v32, %s1760_s5 }
 0x8c9   :  { %v562_v35 = vpop.permute.xlu0 %561 }
 0x8ca   :  { %v564_v38 = vmul.f32 %v562_v35, %v559_v34 }
 0x8cc   :  { %v568_v40 = vadd.f32 %v567_v36, %v564_v38 }
 0x8ce   :  { %v570_v41 = vrot.slane %v568_v40, 4  ;;  %v671_v57 = vrot.slane %v568_v40, 6 }
 0x8d0   :  { %571 = vrot.lane.b32.xlu1 %v570_v41, %s1760_s5 }
 0x942   :  { %v572_v42 = vpop.permute.xlu1 %571 }
 0x943   :  { %1476 = vmatmul.mubr.msk.f32.vlgmr.msra.gmra.mrb[4].mxu1 %vm74_vm0, %v572_v42 }
 0x944   :  { %1592 = vmatpush3.bf16.msra.mxu1 %v1880_v24  ;;  %1497 = vmatprep.mubr.msk.f32.mxu1 %vm1758_vm3, %v1757_v21 }
 0x945   :  { %1593 = vmatprep.subr.bf16.mxu1 %v1756_v9 }
 0x948   :  { %1595 = vmatpush3.bf16.msra.mxu1 %v1891_v28 }
 0x949   :  { %1602 = vmatprep.subr.bf16.mxu1 %v1756_v9 }
 0xa16   :  { %v641_v43 = vpop.f32.mrb[4].mxu1 }
 0xa17   :  { %v642_v44 = vadd.f32 %v1914_v31, %v641_v43  ;;  %v1477_v45 = vpop.f32.mrb[5].mxu1 }
 0xa19   :  { %v646_v46 = vrot.slane %v642_v44, 2 }
 0xa1b   :  { %655 = vrot.lane.b32.xlu0 %v646_v46, %s1759_s24  ;;  %v648_v47 = vadd.f32 %v646_v46, %v1922_v39 }
 0xa1d   :  { %v1336_v48 = vmul.f32 -1.442695, %v648_v47 }
 0xa1f   :  { %1648 = vpow2.f32 %v1336_v48 }
 0xa29   :  { %v1649_v49 = vpop.eup %1648 }
 0xa2a   :  { %v652_v50 = vadd.f32 1.0, %v1649_v49 }
 0xa2c   :  { %1650 = vrcp.f32 %v652_v50 }
 0xa36   :  { %v1651_v51 = vpop.eup %1650 }
 0xa37   :  { %v665_v58 = vsub.f32 1.0, %v1651_v51  ;;  %v673_v60 = vmul.f32 %v1651_v51, %v671_v57 }
 0xa8d   :  { %v656_v52 = vpop.permute.xlu0 %655 }
 0xa8e   :  { %v658_v53 = vmul.f32 %v1651_v51, %v656_v52 }
 0xa90   :  { %660 = vrot.lane.b32.xlu1 %v658_v53, %s1759_s24 }
 0xb02   :  { %v661_v54 = vpop.permute.xlu1 %660 }
 0xb03   :  { %v663_v55 = vadd.f32 %v661_v54, %v1922_v39 }
 0xb05   :  { %1652 = vtanh.f32 %v663_v55 }
 0xb0f   :  { %v1653_v56 = vpop.eup %1652 }
 0xb10   :  { %667 = vrot.lane.b32.xlu0 %v1653_v56, %s1760_s5 }
 0xb82   :  { %v668_v59 = vpop.permute.xlu0 %667 }
 0xb83   :  { %v670_v61 = vmul.f32 %v668_v59, %v665_v58 }
 0xb85   :  { %v674_v62 = vadd.f32 %v673_v60, %v670_v61 }
 0xb87   :  { %v676_v63 = vrot.slane %v674_v62, 6 }
 0xb89   :  { %677 = vrot.lane.b32.xlu1 %v676_v63, %s1760_s5 }
 0xbfb   :  { %v678_v0 = vpop.permute.xlu1 %677 }
 0xbfc   :  { %1487 = vmatmul.mubr.msk.f32.vlgmr.msra.gmra.mrb[6].mxu0 %vm74_vm0, %v678_v0 }
 0xbfd   :  { %1598 = vmatpush3.bf16.msra.mxu0 %v1880_v24  ;;  %1508 = vmatprep.mubr.msk.f32.mxu0 %vm1758_vm3, %v1757_v21 }
 0xbfe   :  { %1599 = vmatprep.subr.bf16.mxu0 %v1756_v9 }
 0xc01   :  { %1601 = vmatpush3.bf16.msra.mxu0 %v1891_v28 }
 0xc02   :  { %1608 = vmatprep.subr.bf16.mxu0 %v1756_v9 }
 0xccf   :  { %v747_v39 = vpop.f32.mrb[6].mxu0 }
 0xcd0   :  { %v748_v1 = vadd.f32 %v1914_v31, %v747_v39  ;;  %v1488_v2 = vpop.f32.mrb[7].mxu0 }
 0xcd2   :  { %759 = vrot.lane.b32.xlu0 %v748_v1, %s1759_s24  ;;  %v751_v3 = vadd.f32 %v748_v1, %v1920_v37 }
 0xcd4   :  { %v1338_v4 = vmul.f32 -1.442695, %v751_v3 }
 0xcd6   :  { %1654 = vpow2.f32 %v1338_v4 }
 0xce0   :  { %v1655_v5 = vpop.eup %1654 }
 0xce1   :  { %v755_v6 = vadd.f32 1.0, %v1655_v5 }
 0xce3   :  { %1656 = vrcp.f32 %v755_v6 }
 0xced   :  { %v1657_v7 = vpop.eup %1656 }
 0xcee   :  { %v769_v14 = vsub.f32 1.0, %v1657_v7  ;;  %v776_v16 = vmul.f32 %v1657_v7, %v676_v63 }
 0xd44   :  { %v760_v8 = vpop.permute.xlu0 %759 }
 0xd45   :  { %v762_v10 = vmul.f32 %v1657_v7, %v760_v8 }
 0xd47   :  { %764 = vrot.lane.b32.xlu1 %v762_v10, %s1759_s24 }
 0xdb9   :  { %v765_v11 = vpop.permute.xlu1 %764 }
 0xdba   :  { %v767_v12 = vadd.f32 %v765_v11, %v1920_v37 }
 0xdbc   :  { %1658 = vtanh.f32 %v767_v12 }
 0xdc6   :  { %v1659_v13 = vpop.eup %1658 }
 0xdc7   :  { %771 = vrot.lane.b32.xlu0 %v1659_v13, %s1760_s5 }
 0xe39   :  { %v772_v15 = vpop.permute.xlu0 %771 }
 0xe3a   :  { %v774_v17 = vmul.f32 %v772_v15, %v769_v14 }
 0xe3c   :  { %v777_v18 = vadd.f32 %v776_v16, %v774_v17  ;;  %v1096_v16 = vld [vmem:[%s2086_s6 + $0x8] sm:$0xff]  ;;  %v1182_v17 = vld [vmem:[%s2088_s8] sm:$0xff] }
 0xe3e   :  { %779 = vrot.lane.b32.xlu1 %v777_v18, %s1760_s5  ;;  %v879_v36 = vrot.slane %v777_v18, 6 }
 0xeb0   :  { %v780_v19 = vpop.permute.xlu1 %779 }
 0xeb1   :  { %1498 = vmatmul.mubr.msk.f32.vlgmr.msra.gmra.mrb[6].mxu1 %vm74_vm0, %v780_v19  ;;  %v1183_v19 = vld [vmem:[%s2088_s8 + $0x8] sm:$0xff] }
 0xeb2   :  { %1604 = vmatpush3.bf16.msra.mxu1 %v1880_v24  ;;  %1519 = vmatprep.mubr.msk.f32.mxu1 %vm1758_vm3, %v1757_v21 }
 0xeb3   :  { %1605 = vmatprep.subr.bf16.mxu1 %v1756_v9 }
 0xeb6   :  { %1607 = vmatpush3.bf16.msra.mxu1 %v1891_v28 }
 0xeb7   :  { %1614 = vmatprep.subr.bf16.mxu1 %v1756_v9 }
 0xf84   :  { %v849_v20 = vpop.f32.mrb[6].mxu1 }
 0xf85   :  { %v850_v22 = vadd.f32 %v1914_v31, %v849_v20  ;;  %v1499_v23 = vpop.f32.mrb[7].mxu1  ;;  %v1098_v20 = vld [vmem:[%s2086_s6 + $0x18] sm:$0xff] }
 0xf86   :  { %v1184_v23 = vld [vmem:[%s2088_s8 + $0x10] sm:$0xff] }
 0xf87   :  { %v854_v25 = vrot.slane %v850_v22, 6  ;;  %v1615_v22 = vpack.c.bf16 %v1183_v19, %v1182_v17 }
 0xf89   :  { %863 = vrot.lane.b32.xlu0 %v854_v25, %s1759_s24  ;;  %v856_v26 = vadd.f32 %v854_v25, %v1920_v37  ;;  %v1185_v25 = vld [vmem:[%s2088_s8 + $0x18] sm:$0xff] }
 0xf8b   :  { %v1340_v27 = vmul.f32 -1.442695, %v856_v26 }
 0xf8d   :  { %1660 = vpow2.f32 %v1340_v27  ;;  %v1618_v27 = vpack.c.bf16 %v1185_v25, %v1184_v23 }
 0xf97   :  { %v1661_v24 = vpop.eup %1660 }
 0xf98   :  { %v860_v29 = vadd.f32 1.0, %v1661_v24 }
 0xf9a   :  { %1662 = vrcp.f32 %v860_v29 }
 0xfa4   :  { %v1663_v30 = vpop.eup %1662 }
 0xfa5   :  { %v873_v38 = vsub.f32 1.0, %v1663_v30  ;;  %v881_v42 = vmul.f32 %v1663_v30, %v879_v36 }
 0xffb   :  { %v864_v32 = vpop.permute.xlu0 %863 }
 0xffc   :  { %v866_v33 = vmul.f32 %v1663_v30, %v864_v32 }
 0xffe   :  { %868 = vrot.lane.b32.xlu1 %v866_v33, %s1759_s24 }
0x1070   :  { %v869_v28 = vpop.permute.xlu1 %868 }
0x1071   :  { %v871_v34 = vadd.f32 %v869_v28, %v1920_v37 }
0x1073   :  { %1664 = vtanh.f32 %v871_v34 }
0x107d   :  { %v1665_v35 = vpop.eup %1664 }
0x107e   :  { %875 = vrot.lane.b32.xlu0 %v1665_v35, %s1760_s5 }
0x10f0   :  { %v876_v40 = vpop.permute.xlu0 %875 }
0x10f1   :  { %v878_v41 = vmul.f32 %v876_v40, %v873_v38 }
0x10f3   :  { %v882_v43 = vadd.f32 %v881_v42, %v878_v41 }
0x10f5   :  { %v884_v44 = vrot.slane %v882_v43, 2  ;;  %v985_v60 = vrot.slane %v882_v43, 6 }
0x10f7   :  { %885 = vrot.lane.b32.xlu1 %v884_v44, %s1760_s5 }
0x1169   :  { %v886_v45 = vpop.permute.xlu1 %885 }
0x116a   :  { %1509 = vmatmul.mubr.msk.f32.vlgmr.msra.gmra.mrb[8].mxu0 %vm74_vm0, %v886_v45 }
0x116b   :  { %1530 = vmatprep.mubr.msk.f32.mxu0 %vm1758_vm3, %v1757_v21 }
0x123d   :  { %v955_v46 = vpop.f32.mrb[8].mxu0 }
0x123e   :  { %v956_v47 = vadd.f32 %v1914_v31, %v955_v46  ;;  %v1510_v48 = vpop.f32.mrb[9].mxu0 }
0x1240   :  { %v960_v49 = vrot.slane %v956_v47, 4  ;;  %v1345_v47 = vld [vmem:[%s2087_s7] ss:$0 sm:$0xff] }
0x1242   :  { %969 = vrot.lane.b32.xlu0 %v960_v49, %s1759_s24  ;;  %v962_v50 = vadd.f32 %v960_v49, %v1920_v37 }
0x1244   :  { %v1342_v51 = vmul.f32 -1.442695, %v962_v50 }
0x1246   :  { %1666 = vpow2.f32 %v1342_v51  ;;  %v1266_v51 = vld [vmem:[%s2090_s10] sm:$0x3] }
0x1250   :  { %v1667_v52 = vpop.eup %1666 }
0x1251   :  { %v966_v53 = vadd.f32 1.0, %v1667_v52 }
0x1253   :  { %1668 = vrcp.f32 %v966_v53 }
0x125d   :  { %v1669_v54 = vpop.eup %1668 }
0x125e   :  { %v979_v61 = vsub.f32 1.0, %v1669_v54  ;;  %v987_v63 = vmul.f32 %v1669_v54, %v985_v60 }
0x12b4   :  { %v970_v55 = vpop.permute.xlu0 %969 }
0x12b5   :  { %v972_v56 = vmul.f32 %v1669_v54, %v970_v55 }
0x12b7   :  { %974 = vrot.lane.b32.xlu1 %v972_v56, %s1759_s24 }
0x1329   :  { %v975_v57 = vpop.permute.xlu1 %974 }
0x132a   :  { %v977_v58 = vadd.f32 %v975_v57, %v1920_v37 }
0x132c   :  { %1670 = vtanh.f32 %v977_v58 }
0x1336   :  { %v1671_v59 = vpop.eup %1670 }
0x1337   :  { %981 = vrot.lane.b32.xlu0 %v1671_v59, %s1760_s5 }
0x13a9   :  { %v982_v62 = vpop.permute.xlu0 %981 }
0x13aa   :  { %v984_v0 = vmul.f32 %v982_v62, %v979_v61 }
0x13ac   :  { %v988_v39 = vadd.f32 %v987_v63, %v984_v0 }
0x13ae   :  { %v990_v1 = vrot.slane %v988_v39, 4  ;;  %v1091_v29 = vrot.slane %v988_v39, 6 }
0x13b0   :  { %991 = vrot.lane.b32.xlu1 %v990_v1, %s1760_s5 }
0x1422   :  { %v992_v2 = vpop.permute.xlu1 %991 }
0x1423   :  { %1520 = vmatmul.mubr.msk.f32.vlgmr.msra.gmra.mrb[8].mxu1 %vm74_vm0, %v992_v2 }
0x1424   :  { %1541 = vmatprep.mubr.msk.f32.mxu1 %vm1758_vm3, %v1757_v21  ;;  %1616 = vmatpush3.bf16.msra.mxu1 %v1615_v22 }
0x1425   :  { %1617 = vmatprep.subr.bf16.mxu1 %v1756_v9 }
0x1428   :  { %1619 = vmatpush3.bf16.msra.mxu1 %v1618_v27 }
0x14f6   :  { %v1061_v3 = vpop.f32.mrb[8].mxu1 }
0x14f7   :  { %v1062_v4 = vadd.f32 %v1914_v31, %v1061_v3  ;;  %v1521_v5 = vpop.f32.mrb[9].mxu1  ;;  %v1095_v31 = vld [vmem:[%s2086_s6] sm:$0xff] }
0x14f8   :  { %v1609_v18 = vpack.c.bf16 %v1096_v16, %v1095_v31 }
0x14f9   :  { %v1066_v6 = vrot.slane %v1062_v4, 2 }
0x14fa   :  { %1610 = vmatpush3.bf16.msra.mxu0 %v1609_v18 }
0x14fb   :  { %1075 = vrot.lane.b32.xlu0 %v1066_v6, %s1759_s24  ;;  %v1068_v7 = vadd.f32 %v1066_v6, %v1920_v37  ;;  %1611 = vmatprep.subr.bf16.mxu0 %v1756_v9  ;;  %v1347_v9 = vld [vmem:[%s2089_s9] ss:$0 sm:$0xff]  ;;  %s1761_s9 = smov [#allocation5]  }
0x14fc   :  { %s1299_s7 = sshll.u32 %s1761_s9, 4  ;;  %s1300_s7 = int_to_ptr.vmem [resolvable:$true] %s1299_s7 }
0x14fd   :  { %v1344_v8 = vmul.f32 -1.442695, %v1068_v7  ;;  %s1704_s4 = scalar_lea.vmem %s1300_s7, 32  ;;  %p1709_p9 = scmp.lt.s32.totalorder %s1300_s7, %s1300_s7 }
0x14fe   :  { %p1705_p8 = scmp.ne.s32.totalorder %s1300_s7, %s1704_s4  ;;  %p1710_p10 = scmp.lt.s32.totalorder %s1704_s4, %s1704_s4 }
0x14ff   :  { %1672 = vpow2.f32 %v1344_v8 }
0x1500   :  { %p1711_p11 = por %p1710_p10, %p1709_p9 }
0x1502   :  { %p1712_p12 = pnand %p1711_p11, %p1705_p8 }
0x1509   :  { %v1673_v10 = vpop.eup %1672 }
0x150a   :  { %v1072_v11 = vadd.f32 1.0, %v1673_v10 }
0x150c   :  { %1674 = vrcp.f32 %v1072_v11 }
0x1516   :  { %v1675_v12 = vpop.eup %1674 }
0x1517   :  { %v1085_v30 = vsub.f32 1.0, %v1675_v12  ;;  %v1093_v33 = vmul.f32 %v1675_v12, %v1091_v29 }
0x156d   :  { %v1076_v13 = vpop.permute.xlu0 %1075 }
0x156e   :  { %v1078_v14 = vmul.f32 %v1675_v12, %v1076_v13 }
0x1570   :  { %1080 = vrot.lane.b32.xlu1 %v1078_v14, %s1759_s24 }
0x15e2   :  { %v1081_v21 = vpop.permute.xlu1 %1080 }
0x15e3   :  { %v1083_v15 = vadd.f32 %v1081_v21, %v1920_v37  ;;  %v1097_v37 = vld [vmem:[%s2086_s6 + $0x10] sm:$0xff] }
0x15e4   :  { %v1612_v26 = vpack.c.bf16 %v1098_v20, %v1097_v37 }
0x15e5   :  { %1676 = vtanh.f32 %v1083_v15 }
0x15e6   :  { %1613 = vmatpush3.bf16.msra.mxu0 %v1612_v26 }
0x15ef   :  { %v1677_v24 = vpop.eup %1676 }
0x15f0   :  { %1087 = vrot.lane.b32.xlu0 %v1677_v24, %s1760_s5 }
0x1662   :  { %v1088_v32 = vpop.permute.xlu0 %1087 }
0x1663   :  { %v1090_v28 = vmul.f32 %v1088_v32, %v1085_v30 }
0x1665   :  { %v1094_v34 = vadd.f32 %v1093_v33, %v1090_v28 }
0x1667   :  { %v1107_v35 = vrot.slane %v1094_v34, 6 }
0x1669   :  { %1108 = vrot.lane.b32.xlu1 %v1107_v35, %s1760_s5 }
0x16db   :  { %v1109_v36 = vpop.permute.xlu1 %1108 }
0x16dc   :  { %1531 = vmatmul.mubr.msk.f32.vlgmr.msra.gmra.mrb[10].mxu0 %vm74_vm0, %v1109_v36  ;;  %1542 = vmatmul.mubr.msk.f32.vlgmr.msra.gmra.mrb[10].mxu1 %vm74_vm0, %v1109_v36 }
0x17af   :  { %v1178_v38 = vpop.f32.mrb[10].mxu0  ;;  %v1259_v40 = vpop.f32.mrb[10].mxu1 }
0x17b0   :  { %v1260_v41 = vadd.f32 %v1347_v9, %v1259_v40  ;;  %v1532_v42 = vpop.f32.mrb[11].mxu0  ;;  %v1543_v43 = vpop.f32.mrb[11].mxu1  ;;  %v1179_v48 = vadd.f32 %v1345_v47, %v1178_v38 }
0x17b2   :  { %v1263_v44 = vmul.f32 0.5, %v1260_v41  ;;  %v1271_v45 = vmul.f32 1.442695, %v1260_v41  ;;  %v1273_v49 = vmul.f32 %v1179_v48, %v1179_v48 }
0x17b4   :  { %v1264_v46 = vmul.f32 1.442695, %v1263_v44  ;;  %1678 = vpow2.f32 %v1271_v45 }
0x17b6   :  { %1680 = vpow2.f32 %v1264_v46 }
0x17be   :  { %v1679_v50 = vpop.eup %1678 }
0x17bf   :  { %v1274_v52 = vadd.f32 %v1679_v50, %v1273_v49 }
0x17c0   :  { %v1681_v53 = vpop.eup %1680 }
0x17c1   :  { %v1349_v54 = vadd.f32 -1.0, %v1274_v52  ;;  %v1267_v55 = vmul.f32 %v1681_v53, %v1266_v51 }
0x17c3   :  { %v1276_v56 = vsub.f32 %v1349_v54, %v1260_v41  ;;  %v1268_v57 = vadd.f32 %v1267_v55, %v1179_v48 }
0x17c5   :  { %v1277_v58 = vsel %vm1269_vm4, %v1276_v56, 0.0  ;;  %1270 = vst.msk [vmem:[#allocation5] sm:$0x3] %vm1269_vm4, %v1268_v57 }
0x17c6   :  { %1278 = vadd.xlane.f32.xlu0 %v1277_v58 }
0x17c7   :  { %1715 = shalt.err (!%p1712_p12)
}
0x17c8   :  { %s1716_s24 = scalar_lea.hbm %s2091_s11, 32 }
0x17c9   :  { %p1717_p13 = scmp.ne.s32.totalorder %s2091_s11, %s1716_s24  ;;  %p1720_p0 = scmp.lt.u32.totalorder %s1716_s24, %s2091_s11 }
0x17cb   :  { %p1722_p1 = pnand %p1720_p0, %p1717_p13 }
0x17cd   :  { %1725 = shalt.err (!%p1722_p1)
}
0x17ce   :  { %1302 = dma.vmem_to_hbm [thread:$0]  %s1300_s7, 32, %s2091_s11, [#allocation4]   ;;  %vm1280_vm5 = vcmask 1041408   ;;  %vm1291_vm6 = vcmask 0  }
0x17cf   :  { %s1762_s28 = smov [#allocation6]  }
0x17d0   :  { %s1309_s29 = sshll.u32 %s1762_s28, 4  ;;  %s1310_s29 = int_to_ptr.vmem [resolvable:$true] %s1309_s29 }
0x17d1   :  { %s1726_s1 = scalar_lea.vmem %s1310_s29, 16  ;;  %s1730_s30 = scalar_lea.vmem %s1310_s29, 32 }
0x17d2   :  { %p1727_p2 = scmp.ne.s32.totalorder %s1310_s29, %s1726_s1  ;;  %p1731_p3 = scmp.lt.s32.totalorder %s1310_s29, %s1310_s29 }
0x17d3   :  { %p1732_p4 = scmp.lt.s32.totalorder %s1730_s30, %s1726_s1 }
0x17d5   :  { %p1733_p5 = por %p1732_p4, %p1731_p3 }
0x17d7   :  { %p1734_p6 = pnand %p1733_p5, %p1727_p2 }
0x1853   :  { %v1279_v59 = vpop.xlane.xlu0 %1278 }
0x1854   :  { %v1281_v60 = vsel %vm1280_vm5, %v1279_v59, 0.0 }
0x1855   :  { %v1282_v61 = vrot.slane %v1281_v60, 4 }
0x1857   :  { %v1283_v62 = vadd.f32 %v1282_v61, %v1281_v60 }
0x1859   :  { %v1284_v63 = vrot.slane %v1283_v62, 2 }
0x185b   :  { %v1285_v0 = vadd.f32 %v1284_v63, %v1283_v62 }
0x185d   :  { %v1286_v39 = vrot.slane %v1285_v0, 1 }
0x185f   :  { %v1287_v1 = vadd.f32 %v1286_v39, %v1285_v0 }
0x1861   :  { %v1289_v2 = vmul.f32 0.5, %v1287_v1 }
0x1863   :  { %v1290_v3 = vmul.f32 0.5, %v1289_v2 }
0x1865   :  { %1292 = vst.msk [vmem:[#allocation6] sm:$0x1] %vm1291_vm6, %v1290_v3 }
0x1866   :  { %1737 = shalt.err (!%p1734_p6)
}
0x1867   :  { %s1738_s13 = scalar_lea.hbm %s2092_s12, 16 }
0x1868   :  { %p1739_p7 = scmp.ne.s32.totalorder %s2092_s12, %s1738_s13  ;;  %p1742_p8 = scmp.lt.u32.totalorder %s1738_s13, %s2092_s12 }
0x186a   :  { %p1744_p9 = pnand %p1742_p8, %p1739_p7 }
0x186c   :  { %1747 = shalt.err (!%p1744_p9)
}
0x186d   :  { %1312 = dma.vmem_to_hbm [thread:$0]  %s1310_s29, 16, %s2092_s12, [#allocation7]  }
0x186e   :  { %1750 = dma.done.wait [#allocation4], 32  }
0x186f   :  { %1751 = vsyncadd [#allocation4], 4294967264 }
0x1870   :  { %1752 = dma.done.wait [#allocation7], 16  }
0x1871   :  { %1753 = vsyncadd [#allocation7], 4294967280 }
0x1872   :  { %1319 = vsyncpa [#allocation3], 1 }
0x1873   :  { %1320 = vsyncpa [#allocation4], 1 }
0x1874   :  { %1321 = vsyncpa [#allocation7], 1 }

</bundles_post_ra>
